<compile_context>
chip_gen: v6e
topology: v6e:2x2x1
jax: 0.10.0
libtpu: 0.0.40
codegen_flags: <defaults>
</compile_context>

<pallas_src>
import jax
import jax.numpy as jnp
from jax.experimental import pallas as pl
from jax.experimental.pallas import tpu as pltpu

_LANE = 128                          # last block dim: 128-aligned or full dim
_SUBLANE = 8                         # second-to-last block dim alignment


def _round_up(x, m):
    return (x + m - 1) // m * m


def _vmem_capacity_bytes():
    """Per-core VMEM capacity; conservative (v7x-sized) fallback."""
    try:
        return int(pltpu.get_tpu_info().vmem_capacity_bytes)
    except Exception:  # older jax / query unavailable
        return 64 * 1024 * 1024


# ----------------------------- Pallas kernel --------------------------------
def _patch_proj_kernel(x_ref, w_ref, b_ref, o_ref):
    # x_ref: (tm, K) patch rows (bf16), w_ref: (K, E_pad) (bf16),
    # b_ref: (1, E_pad) f32, o_ref: (tm, E_pad) in out_dtype.
    acc = jnp.dot(x_ref[...], w_ref[...], preferred_element_type=jnp.float32)
    # Bias add stays in the f32 accumulator (v5e has no native bf16 VPU math).
    o_ref[...] = (acc + b_ref[...]).astype(o_ref.dtype)


def _patch_proj(patches, w2d, b2d, *, out_dtype, tm, vmem_limit_bytes):
    """patches: (M, K), w2d: (K, E_pad), b2d: (1, E_pad) -> (M, E_pad)."""
    M, K = patches.shape
    _, E_pad = w2d.shape
    grid = (pl.cdiv(M, tm),)                     # ragged last tile is masked
    return pl.pallas_call(
        _patch_proj_kernel,
        out_shape=jax.ShapeDtypeStruct((M, E_pad), out_dtype),
        grid_spec=pltpu.PrefetchScalarGridSpec(
            num_scalar_prefetch=0,
            grid=grid,
            in_specs=[
                # Patch rows: streamed (double-buffered) along the grid.
                pl.BlockSpec((tm, K), lambda i: (i, 0)),
                # Weight / bias: constant index_map -> fetched once, resident.
                pl.BlockSpec((K, E_pad), lambda i: (0, 0)),
                pl.BlockSpec((1, E_pad), lambda i: (0, 0)),
            ],
            out_specs=pl.BlockSpec((tm, E_pad), lambda i: (i, 0)),
        ),
        compiler_params=pltpu.CompilerParams(
            dimension_semantics=("parallel",),   # rows independent -> megacore
            vmem_limit_bytes=vmem_limit_bytes,
        ),
    )(patches, w2d, b2d)


def _plan_tiles(M, K, E_pad, in_bytes, out_bytes):
    """Pick the M tile and a generation-aware vmem_limit_bytes."""
    cap = _vmem_capacity_bytes()
    # Tile budget: ~40% of VMEM, capped (v5e/v6e ~48 MiB, v7x ~25 MiB).
    budget = min(48 * 1024 * 1024, (cap * 2) // 5)
    # Resident weight/bias: double-buffered by the pipeline -> count 2x.
    fixed = 2 * K * E_pad * in_bytes + 2 * E_pad * 4
    # Per patch-row: double-buffered input block + double-buffered output.
    per_row = 2 * K * in_bytes + 2 * E_pad * out_bytes
    avail = max(budget - fixed, _SUBLANE * per_row)
    tm = int(min(1024, avail // per_row))
    # >= 2 grid steps whenever M allows, so both v7x TensorCores get work.
    tm = min(tm, _round_up(pl.cdiv(M, 2), _SUBLANE))
    tm = max(_SUBLANE, (tm // _SUBLANE) * _SUBLANE)
    if tm >= M:
        tm = M                        # one full block (legal for any M)
    footprint = fixed + tm * per_row
    # No 32 MiB floor; ceiling stays well under physical VMEM (48 MiB on v7x).
    ceiling = min(96 * 1024 * 1024, (cap * 3) // 4)
    vmem_limit = int(min(ceiling, footprint + 4 * 1024 * 1024))
    return tm, vmem_limit


# ------------------------------ Module wrapper -------------------------------
class PatchEmbedPallas:
    """JAX/Pallas equivalent of the PyTorch PatchEmbed (norm_layer=None)."""

    def __init__(self, img_size=16, patch_size=8, num_frames=2,
                 tubelet_size=1, in_chans=4, embed_dim=32, *,
                 flatten=True, bias=True, compute_dtype=jnp.bfloat16,
                 out_dtype=jnp.bfloat16, key=None):
        self.img_size = (img_size, img_size)
        self.patch_size = (patch_size, patch_size)
        self.num_frames = num_frames
        self.tubelet_size = tubelet_size
        self.in_chans = in_chans
        self.embed_dim = embed_dim
        self.flatten = flatten
        self.compute_dtype = compute_dtype
        self.out_dtype = out_dtype
        self.grid_size = (num_frames // tubelet_size,
                          img_size // patch_size,
                          img_size // patch_size)
        self.num_patches = self.grid_size[0] * self.grid_size[1] * self.grid_size[2]

        # Deterministic parameter init (conv weight shape: E, C, tub, p, p).
        key = jax.random.PRNGKey(0) if key is None else key
        kw, kb = jax.random.split(key)
        wshape = (embed_dim, in_chans, tubelet_size, patch_size, patch_size)
        fan_in = in_chans * tubelet_size * patch_size * patch_size
        bound = 1.0 / jnp.sqrt(fan_in)
        self.weight = jax.random.uniform(kw, wshape, jnp.float32, -bound, bound)
        self.bias = (jax.random.uniform(kb, (embed_dim,), jnp.float32, -bound, bound)
                     if bias else jnp.zeros((embed_dim,), jnp.float32))

        # Pre-transposed / lane-padded / pre-cast matmul operands (once, not
        # per call).  E is padded to a multiple of 128 so output stores are
        # lane-dense.  K is *not* padded: the kernel's K block equals the full
        # dim, which satisfies the layout constraint for any channel count.
        K = fan_in
        E_pad = _round_up(embed_dim, _LANE)
        self._K = K
        self._E_pad = E_pad
        w2d = self.weight.reshape(embed_dim, K).T                       # (K, E)
        self._w2d = jnp.pad(w2d, ((0, 0), (0, E_pad - embed_dim))
                            ).astype(compute_dtype)                     # (K, E_pad)
        self._b2d = jnp.pad(self.bias, (0, E_pad - embed_dim)
                            ).reshape(1, E_pad).astype(jnp.float32)     # (1, E_pad)

    def __call__(self, x):
        # x: (B, C, T, H, W)  -- PyTorch NCDHW layout.
        B, C, T, H, W = x.shape
        gt, gh, gw = self.grid_size
        tub = self.tubelet_size
        ph, pw = self.patch_size
        E, E_pad, K = self.embed_dim, self._E_pad, self._K

        # im2col in XLA: cast to the narrow compute dtype *before* the
        # patchification transpose so that pass writes half the bytes.
        xc = x.astype(self.compute_dtype)
        xp = xc.reshape(B, C, gt, tub, gh, ph, gw, pw)
        xp = xp.transpose(0, 2, 4, 6, 1, 3, 5, 7)    # (B, gt, gh, gw, C, tub, ph, pw)
        M = B * gt * gh * gw
        patches = xp.reshape(M, K)                   # no M padding / extra copy

        in_b = jnp.dtype(self.compute_dtype).itemsize
        out_b = jnp.dtype(self.out_dtype).itemsize
        tm, vmem_limit = _plan_tiles(M, K, E_pad, in_b, out_b)

        out = _patch_proj(patches, self._w2d, self._b2d,
                          out_dtype=self.out_dtype, tm=tm,
                          vmem_limit_bytes=vmem_limit)           # (M, E_pad)

        out = out[:, :E].reshape(B, gt * gh * gw, E)  # flatten(2).transpose(1,2)
        if not self.flatten:
            out = out.reshape(B, gt, gh, gw, E).transpose(0, 4, 1, 2, 3)
        return out  # norm_layer=None -> Identity


# ----------------------------------- main ------------------------------------
if __name__ == "__main__":
    key = jax.random.PRNGKey(0)
    kx, kp = jax.random.split(key)

    B, C, T, H, W = 2, 4, 2, 16, 16
    x = jax.random.normal(kx, (B, C, T, H, W), jnp.float32)

    module = PatchEmbedPallas(img_size=16, patch_size=8, num_frames=T,
                              tubelet_size=1, in_chans=C, embed_dim=32, key=kp)

    fwd = jax.jit(module.__call__)
    out = jax.block_until_ready(fwd(x))

    # Cross-check against a pure-JAX f32 Conv3d reference (PyTorch semantics).
    ref = jax.lax.conv_general_dilated(
        x, module.weight,
        window_strides=(module.tubelet_size, *module.patch_size),
        padding="VALID",
        dimension_numbers=("NCDHW", "OIDHW", "NCDHW"),
    ) + module.bias.reshape(1, -1, 1, 1, 1)
    ref = ref.reshape(B, module.embed_dim, -1).transpose(0, 2, 1)

    assert out.shape == (B, module.num_patches, module.embed_dim), out.shape
    # bf16 MXU operands with f32 accumulation and bf16 output -> loose-but-safe
    # tolerance against the f32 conv reference.
    out_f32 = out.astype(jnp.float32)
    max_err = float(jnp.max(jnp.abs(out_f32 - ref)))
    assert jnp.allclose(out_f32, ref, atol=3e-2, rtol=3e-2), max_err
    print("KERNEL_OK")
</pallas_src>

<mosaic_0001>
module attributes {stable_mosaic.version = 11 : i64} {
  func.func @_patch_proj_kernel(%arg0: i32, %arg1: memref<8x256xbf16, #tpu.memory_space<vmem>>, %arg2: memref<256x128xbf16, #tpu.memory_space<vmem>>, %arg3: memref<1x128xf32, #tpu.memory_space<vmem>>, %arg4: memref<8x128xbf16, #tpu.memory_space<vmem>>) attributes {dimension_semantics = [#tpu.dimension_semantics<parallel>], iteration_bounds = array<i64: 2>, scalar_prefetch = 0 : i64, scratch_operands = 0 : i64, tpu.core_type = #tpu.core_type<tc>, window_params = [{transform_indices = @transform_0, window_bounds = array<i64: 8, 256>}, {pipeline_mode = #tpu.pipeline_mode<synchronous>, transform_indices = @transform_1, window_bounds = array<i64: 256, 128>}, {pipeline_mode = #tpu.pipeline_mode<synchronous>, transform_indices = @transform_2, window_bounds = array<i64: 1, 128>}, {transform_indices = @transform_3, window_bounds = array<i64: 8, 128>}]} {
    %c0 = arith.constant 0 : index
    %c0_0 = arith.constant 0 : index
    %0 = vector.load %arg1[%c0, %c0_0] : memref<8x256xbf16, #tpu.memory_space<vmem>>, vector<8x256xbf16>
    %c0_1 = arith.constant 0 : index
    %c0_2 = arith.constant 0 : index
    %1 = vector.load %arg2[%c0_1, %c0_2] : memref<256x128xbf16, #tpu.memory_space<vmem>>, vector<256x128xbf16>
    %cst = arith.constant dense<0.000000e+00> : vector<8x128xf32>
    %2 = tpu.matmul %0, %1, %cst {dimension_numbers = #tpu.dot_dimension_numbers<[1], [0], [0], [1], [0, 0, 1, 1], [], []>} : vector<8x256xbf16>, vector<256x128xbf16>, vector<8x128xf32> -> vector<8x128xf32>
    %c0_3 = arith.constant 0 : index
    %c0_4 = arith.constant 0 : index
    %3 = vector.load %arg3[%c0_3, %c0_4] : memref<1x128xf32, #tpu.memory_space<vmem>>, vector<1x128xf32>
    %4 = vector.broadcast %3 : vector<1x128xf32> to vector<8x128xf32>
    %5 = arith.addf %2, %4 : vector<8x128xf32>
    %6 = arith.truncf %5 : vector<8x128xf32> to vector<8x128xbf16>
    %c0_5 = arith.constant 0 : index
    %c0_6 = arith.constant 0 : index
    %7 = vector.load %arg4[%c0_5, %c0_6] : memref<8x128xbf16, #tpu.memory_space<vmem>>, vector<8x128xbf16>
    tpu.vector_store %arg4[%c0_5, %c0_6], %6 {strides = array<i32>} : memref<8x128xbf16, #tpu.memory_space<vmem>>, vector<8x128xbf16>,
    return
  }
  func.func @transform_0(%arg0: i32) -> (i32, i32) {
    %c0_i32 = arith.constant 0 : i32
    %c0_i32_0 = arith.constant 0 : i32
    return %arg0, %c0_i32 : i32, i32
  }
  func.func @transform_1(%arg0: i32) -> (i32, i32) {
    %c0_i32 = arith.constant 0 : i32
    %c0_i32_0 = arith.constant 0 : i32
    %c0_i32_1 = arith.constant 0 : i32
    return %c0_i32, %c0_i32_0 : i32, i32
  }
  func.func @transform_2(%arg0: i32) -> (i32, i32) {
    %c0_i32 = arith.constant 0 : i32
    %c0_i32_0 = arith.constant 0 : i32
    %c0_i32_1 = arith.constant 0 : i32
    return %c0_i32, %c0_i32_0 : i32, i32
  }
  func.func @transform_3(%arg0: i32) -> (i32, i32) {
    %c0_i32 = arith.constant 0 : i32
    %c0_i32_0 = arith.constant 0 : i32
    return %arg0, %c0_i32 : i32, i32
  }
}

</mosaic_0001>

<bundles_post_ra>
// kernel: a_call__.1
= control target key start
LH: loop header
LB: loop body
LE: loop exit
PB: predicated region body
PF: predicated region fallthrough
CT: control target
= control target key end

     0   :  { %s514_s12 = smov 0   ;;  %s586_s0 = inlined_call_operand.vmem [shape: bf16[16,256], index: 0, kind: input, shape index: {}]   ;;  %s587_s1 = inlined_call_operand.vmem [shape: bf16[256,128], index: 1, kind: input, shape index: {}]   ;;  %s588_s2 = inlined_call_operand.vmem [shape: f32[1,128], index: 2, kind: input, shape index: {}]   ;;  %s589_s3 = inlined_call_operand.vmem [shape: bf16[16,128], index: 3, kind: output, shape index: {}]  }
   0x1 LB: > { %s408_s13 = sadd.s32 4294967295, %s492_s12   ;;  %p412_p0 = scmp.ge.s32.totalorder %s492_s12, 1  ;;  %s492_s12 = sphi %s514_s12, %s13_s12  }
   0x2   : > { %p137_p1 = scmp.lt.s32.totalorder %s492_s12, 3 }
   0x4   : > { %p138_p2 = pnand %p412_p0, %p137_p1 }
   0x5   : > { %p160_p3 = scmp.lt.s32.totalorder (!%p138_p2), %s408_s13, 1 }
   0x6   : > { %141 = sbr.rel (%p138_p2) target bundleno = 246 (0xf6), region = 32 }
   0xb   : > { %v468_v0 = vld [vmem:[%s587_s1 + $0x78] sm:$0xff]   ;;  %v470_v2 = vld [vmem:[%s587_s1 + $0x70] sm:$0xff]   ;;  %v472_v4 = vld [vmem:[%s587_s1 + $0x68] sm:$0xff]   ;;  %s591_s13 = smov (!%p160_p3, %s408_s13), 1 }
   0xc   : > { %v469_v1 = vld [vmem:[%s587_s1 + $0x38] sm:$0xff]   ;;  %438 = vmatprep.subr.bf16.mxu0 %v468_v0  ;;  %v471_v3 = vld [vmem:[%s587_s1 + $0x30] sm:$0xff]   ;;  %v473_v5 = vld [vmem:[%s587_s1 + $0x28] sm:$0xff]   ;;  %s437_s28 = sshll.u32 %s591_s13, 3  ;;  %s415_s27 = sshll.u32 %s591_s13, 2 }
   0xd   : > { %439 = vmatpush3.bf16.msra.mxu0 %v469_v1  ;;  %v474_v6 = vld [vmem:[%s587_s1 + $0x60] sm:$0xff]   ;;  %v476_v8 = vld [vmem:[%s587_s1 + $0x58] sm:$0xff]   ;;  %s164_s8 = scalar_lea.vmem %s586_s0, %s437_s28  ;;  %v478_v10 = vld [vmem:[%s587_s1 + $0x50] sm:$0xff]   ;;  %s168_s30 = scalar_lea.vmem %s589_s3, %s415_s27 }
   0xe   : > { %440 = vmatprep.subr.bf16.mxu0 %v470_v2  ;;  %v475_v7 = vld [vmem:[%s587_s1 + $0x20] sm:$0xff]   ;;  %v477_v9 = vld [vmem:[%s587_s1 + $0x18] sm:$0xff]   ;;  %v479_v13 = vld [vmem:[%s587_s1 + $0x10] sm:$0xff]  }
   0xf   : > { %v170_v11 = vld [vmem:[%s164_s8] sm:$0xff]  ;;  %v480_v14 = vld [vmem:[%s587_s1 + $0x48] sm:$0xff]  }
  0x10   : > { %v418_v12 = vcombine.high %v170_v11, %v170_v11  ;;  %v481_v15 = vld [vmem:[%s587_s1 + $0x8] sm:$0xff]   ;;  %v482_v16 = vld [vmem:[%s587_s1 + $0x40] sm:$0xff]   ;;  %v417_v18 = vcombine.low %v170_v11, %v170_v11 }
  0x11   : > { %441 = vmatpush3.bf16.msra.mxu0 %v471_v3  ;;  %v483_v17 = vld [vmem:[%s587_s1] sm:$0xff]  }
  0x12   : > { %442 = vmatprep.subr.bf16.mxu0 %v472_v4  ;;  %345 = vmatprep.mubr.bf16.mxu0 %v418_v12  ;;  %v416_v20 = vld [vmem:[%s588_s2] ss:$0 sm:$0xff] }
  0x15   : > { %443 = vmatpush3.bf16.msra.mxu0 %v473_v5 }
  0x16   : > { %444 = vmatprep.subr.bf16.mxu0 %v474_v6 }
  0x19   : > { %445 = vmatpush3.bf16.msra.mxu0 %v475_v7 }
  0x1a   : > { %446 = vmatprep.subr.bf16.mxu0 %v476_v8 }
  0x1d   : > { %447 = vmatpush3.bf16.msra.mxu0 %v477_v9 }
  0x1e   : > { %448 = vmatprep.subr.bf16.mxu0 %v478_v10 }
  0x21   : > { %449 = vmatpush3.bf16.msra.mxu0 %v479_v13 }
  0x22   : > { %450 = vmatprep.subr.bf16.mxu0 %v480_v14 }
  0x25   : > { %451 = vmatpush3.bf16.msra.mxu0 %v481_v15 }
  0x26   : > { %452 = vmatprep.subr.bf16.mxu0 %v482_v16 }
  0x29   : > { %453 = vmatpush3.bf16.msra.mxu0 %v483_v17 }
  0x2c   : > { %346 = vmatmul.mubr.bf16.vlgmr.msra.gmra.mxu0 %v417_v18 }
  0xec   : > { %v454_v19 = vpop.f32.mrf.mxu0 }
  0xee   : > { %v455_v21 = vpop.f32.mrf.mxu0 }
  0xef   : > { %v456_v22 = vadd.f32 %v455_v21, %v454_v19 }
  0xf0   : > { %v457_v23 = vpop.f32.mrf.mxu0 }
  0xf1   : > { %v348_v24 = vadd.f32 %v456_v22, %v416_v20 }
  0xf2   : > { %v458_v25 = vpop.f32.mrf.mxu0 }
  0xf3   : > { %v353_v26 = vpack.c.bf16 %v348_v24, %v348_v24 }
  0xf5   : > { %354 = vst [vmem:[%s168_s30] sm:$0xf] %v353_v26 }
  0xf6 PF: > { %s13_s12 = sadd.s32 1, %s492_s12  }
  0xf7   : > { %p10_p4 = scmp.ge.s32.totalorder %s13_s12, 4  }
  0xf9   :  { %12 = sbr.rel (!%p10_p4) target bundleno = 1 (0x1), region = 62 }

</bundles_post_ra>
